<compile_context>
chip_gen: v7x
topology: tpu7x:2x2x1
jax: 0.10.0
libtpu: 0.0.40
codegen_flags: <defaults>
</compile_context>

<pallas_src>
import functools

import jax
import jax.numpy as jnp
from jax.experimental import pallas as pl
from jax.experimental.pallas import tpu as pltpu


def _mha_flash_kernel(x_ref, wq_ref, bq_ref, wkv_ref, bkv_ref, wo_ref, bo_ref,
                      o_ref,
                      q_scr, m_scr, l_scr, acc_scr, out_scr, *,
                      num_heads, head_dim, emb_size, kv_block, compute_dtype):
    h = pl.program_id(1)
    kv = pl.program_id(2)
    n_kv = pl.num_programs(2)
    d = head_dim
    cd = compute_dtype
    inv_scale = 1.0 / (emb_size ** 0.5)   # module divides energy by sqrt(emb_size)

    # ---- init per (batch, head): project Q for all rows, reset online-softmax state.
    @pl.when(kv == 0)
    def _init():
        x_full = x_ref[0].astype(cd)                                   # (N, E)
        q = jnp.dot(x_full, wq_ref[0], preferred_element_type=jnp.float32)
        q = (q + bq_ref[0]) * inv_scale        # fold 1/sqrt(E) into q (O(N*d))
        q_scr[...] = q.astype(cd)
        m_scr[...] = jnp.full(m_scr.shape, -jnp.inf, dtype=jnp.float32)
        l_scr[...] = jnp.zeros(l_scr.shape, dtype=jnp.float32)
        acc_scr[...] = jnp.zeros(acc_scr.shape, dtype=jnp.float32)

        @pl.when(h == 0)
        def _():
            out_scr[...] = jnp.zeros(out_scr.shape, dtype=jnp.float32)

    # ---- one kv chunk: project K/V for these rows only, online-softmax update.
    start = pl.multiple_of(kv * kv_block, kv_block)
    xc = x_ref[0, pl.ds(start, kv_block), :].astype(cd)                # (tk, E)
    kvp = jnp.dot(xc, wkv_ref[0], preferred_element_type=jnp.float32) + bkv_ref[0]
    k_c = kvp[:, :d].astype(cd)                                        # (tk, d)
    v_c = kvp[:, d:].astype(cd)                                        # (tk, d)

    # s[q, k] = sum_d q[q, d] * k_c[k, d]   (fp32 MXU accumulation)
    s = jax.lax.dot_general(q_scr[...], k_c, (((1,), (1,)), ((), ())),
                            preferred_element_type=jnp.float32)        # (N, tk)

    m_prev = m_scr[...]
    m_new = jnp.maximum(m_prev, jnp.max(s, axis=-1, keepdims=True))
    alpha = jnp.exp(m_prev - m_new)                                    # fp32
    # exp in the compute dtype: bf16 EUP on v6e/v7x; pass compute_dtype=f32 on v5e.
    p = jnp.exp((s - m_new).astype(cd))                                # (N, tk)
    l_scr[...] = alpha * l_scr[...] + jnp.sum(p.astype(jnp.float32),
                                              axis=-1, keepdims=True)
    acc_scr[...] = alpha * acc_scr[...] + jnp.dot(
        p, v_c, preferred_element_type=jnp.float32)
    m_scr[...] = m_new

    # ---- finalize this head: deferred normalization (O(N*d)), fold output projection.
    @pl.when(kv == n_kv - 1)
    def _finalize():
        # NOTE: approx reciprocal (~1e-3 rel err) -- fine for inference; use an
        # exact divide if this kernel is reused for training.
        ctx = (acc_scr[...] * pl.reciprocal(l_scr[...], approx=True)).astype(cd)
        out_scr[...] += jnp.dot(ctx, wo_ref[0], preferred_element_type=jnp.float32)

        @pl.when(h == num_heads - 1)
        def _():
            o_ref[0] = (out_scr[...] + bo_ref[...]).astype(o_ref.dtype)


def _pick_kv_block(n, target=512):
    """Largest divisor of n that is <= target, preferring multiples of 128."""
    if n <= target:
        return n
    fallback = None
    for t in range(target, 0, -1):
        if n % t == 0:
            if t % 128 == 0:
                return t
            if fallback is None:
                fallback = t
    return fallback if fallback is not None else n


def _vmem_limit_bytes(N, E, d, tk, cbytes):
    """Generation-aware VMEM limit: generous working-set estimate, clamped to
    ~85% of this chip's physical VMEM (128 MiB v5e/v6e, 64 MiB per TC on v7x)."""
    f32 = 4
    lane = 128
    pad = lambda v: max(v, lane)
    x_blk = 2 * N * E * f32                       # fp32 input block, double-buffered
    o_blk = 2 * N * E * f32                       # output block, double-buffered
    w_blk = 2 * (E * pad(d) + E * pad(2 * d) + d * E + 3 * pad(2 * d)) * max(cbytes, f32)
    scratch = (N * pad(d) * cbytes                # q
               + 2 * N * lane * f32               # running max / denom (lane padded)
               + N * pad(d) * f32                 # unnormalized ctx accumulator
               + N * E * f32)                     # output-projection accumulator
    work = 3 * N * pad(tk) * f32 + 2 * tk * E * max(cbytes, f32) + N * E * cbytes
    est = x_blk + o_blk + w_blk + scratch + work
    try:
        cap = pltpu.get_tpu_info().vmem_capacity_bytes
    except Exception:
        cap = 128 * 1024 * 1024
    return int(min(int(cap * 0.85), max(32 * 1024 * 1024, 2 * est)))


def multi_head_attention(x, params, *, num_heads, compute_dtype=jnp.bfloat16,
                         kv_block=512, out_dtype=None):
    """x: (B, N, E) float32.  params: (in, out)-layout weights, (1, out) biases."""
    B, N, E = x.shape
    H = num_heads
    assert E % H == 0, "emb_size must be divisible by num_heads"
    d = E // H
    tk = _pick_kv_block(N, kv_block)
    assert N % tk == 0
    n_kv = N // tk
    out_dtype = x.dtype if out_dtype is None else out_dtype
    cbytes = jnp.dtype(compute_dtype).itemsize

    # Per-head weight slabs built once in the wrapper (HBM-side layout plumbing).
    # The head split is then pure BlockSpec indexing of the leading H axis:
    # the kernel never slices the lane axis into d-wide pieces.
    def per_head(w):        # (E, E) -> (H, E, d)
        return w.reshape(E, H, d).transpose(1, 0, 2)

    def per_head_bias(b):   # (1, E) -> (H, 1, d)
        return b.reshape(1, H, d).transpose(1, 0, 2)

    wq = per_head(params["wq"]).astype(compute_dtype)                       # (H, E, d)
    bq = per_head_bias(params["bq"]).astype(jnp.float32)                    # (H, 1, d)
    wkv = jnp.concatenate([per_head(params["wk"]), per_head(params["wv"])],
                          axis=-1).astype(compute_dtype)                    # (H, E, 2d)
    bkv = jnp.concatenate([per_head_bias(params["bk"]), per_head_bias(params["bv"])],
                          axis=-1).astype(jnp.float32)                      # (H, 1, 2d)
    wo = params["wo"].reshape(H, d, E).astype(compute_dtype)                # (H, d, E)
    bo = params["bo"].astype(jnp.float32)                                   # (1, E)

    kernel = functools.partial(
        _mha_flash_kernel, num_heads=H, head_dim=d, emb_size=E,
        kv_block=tk, compute_dtype=compute_dtype)

    return pl.pallas_call(
        kernel,
        out_shape=jax.ShapeDtypeStruct((B, N, E), out_dtype),
        grid_spec=pltpu.PrefetchScalarGridSpec(
            num_scalar_prefetch=0,
            grid=(B, H, n_kv),
            in_specs=[
                pl.BlockSpec((1, N, E), lambda b, h, k: (b, 0, 0)),      # x (fp32, cast in-kernel)
                pl.BlockSpec((1, E, d), lambda b, h, k: (h, 0, 0)),      # Wq per head
                pl.BlockSpec((1, 1, d), lambda b, h, k: (h, 0, 0)),      # bq per head
                pl.BlockSpec((1, E, 2 * d), lambda b, h, k: (h, 0, 0)),  # W[k|v] per head
                pl.BlockSpec((1, 1, 2 * d), lambda b, h, k: (h, 0, 0)),  # b[k|v] per head
                pl.BlockSpec((1, d, E), lambda b, h, k: (h, 0, 0)),      # Wo per head
                pl.BlockSpec((1, E), lambda b, h, k: (0, 0)),            # bo (constant)
            ],
            out_specs=pl.BlockSpec((1, N, E), lambda b, h, k: (b, 0, 0)),
            scratch_shapes=[
                pltpu.VMEM((N, d), compute_dtype),   # q for the current (batch, head)
                pltpu.VMEM((N, 1), jnp.float32),     # running max
                pltpu.VMEM((N, 1), jnp.float32),     # running softmax denominator
                pltpu.VMEM((N, d), jnp.float32),     # unnormalized context accumulator
                pltpu.VMEM((N, E), jnp.float32),     # output-projection accumulator
            ]),
        compiler_params=pltpu.CompilerParams(
            dimension_semantics=("parallel", "arbitrary", "arbitrary"),
            vmem_limit_bytes=_vmem_limit_bytes(N, E, d, tk, cbytes)),
    )(x, wq, bq, wkv, bkv, wo, bo)


def _reference(x, params, num_heads):
    """Pure-JAX fp32 reference mirroring the PyTorch forward (eval mode, mask=None)."""
    B, N, E = x.shape
    d = E // num_heads

    def lin(t, w, b):
        return t @ w + b

    q = lin(x, params["wq"], params["bq"])
    k = lin(x, params["wk"], params["bk"])
    v = lin(x, params["wv"], params["bv"])

    def split(t):  # b n (h d) -> b h n d
        return t.reshape(B, N, num_heads, d).transpose(0, 2, 1, 3)

    q, k, v = split(q), split(k), split(v)
    energy = jnp.einsum("bhqd,bhkd->bhqk", q, k)
    att = jax.nn.softmax(energy / (E ** 0.5), axis=-1)
    out = jnp.einsum("bhal,bhlv->bhav", att, v)
    out = out.transpose(0, 2, 1, 3).reshape(B, N, E)  # b h n d -> b n (h d)
    return lin(out, params["wo"], params["bo"])


if __name__ == "__main__":
    B, N, E, H = 2, 8, 32, 4  # batch, seq, emb_size, num_heads

    key = jax.random.PRNGKey(0)
    keys = jax.random.split(key, 10)

    x = jax.random.normal(keys[0], (B, N, E), dtype=jnp.float32)

    def make_linear(kw, kb):
        # nn.Linear(E, E): weight (out, in), bias (out,). Stored as (in, out) / (1, out).
        w = jax.random.normal(kw, (E, E), dtype=jnp.float32) * (1.0 / (E ** 0.5))
        b = jax.random.normal(kb, (1, E), dtype=jnp.float32) * 0.01
        return w, b

    wq, bq = make_linear(keys[1], keys[2])
    wk, bk = make_linear(keys[3], keys[4])
    wv, bv = make_linear(keys[5], keys[6])
    wo, bo = make_linear(keys[7], keys[8])

    params = dict(wq=wq, bq=bq, wk=wk, bk=bk, wv=wv, bv=bv, wo=wo, bo=bo)

    ref = jax.block_until_ready(_reference(x, params, H))

    # fp32 MXU / fp32 exp path (tight check; only the approx reciprocal differs).
    out_f32 = jax.block_until_ready(
        multi_head_attention(x, params, num_heads=H, compute_dtype=jnp.float32))
    assert out_f32.shape == (B, N, E)
    assert jnp.allclose(out_f32, ref, atol=5e-3, rtol=5e-3), "fp32 mismatch vs reference"

    # Default bf16 MXU / bf16 exp path (fp32 running stats & accumulation).
    out_bf16 = jax.block_until_ready(
        multi_head_attention(x, params, num_heads=H))
    assert out_bf16.shape == (B, N, E)
    assert jnp.allclose(out_bf16, ref, atol=5e-2, rtol=5e-2), "bf16 mismatch vs reference"

    print("KERNEL_OK")
</pallas_src>

<mosaic_0001>
module attributes {stable_mosaic.version = 11 : i64} {
  func.func @_mha_flash_kernel(%arg0: i32, %arg1: i32, %arg2: i32, %arg3: memref<1x8x32xf32, #tpu.memory_space<vmem>>, %arg4: memref<1x32x8xf32, #tpu.memory_space<vmem>>, %arg5: memref<1x1x8xf32, #tpu.memory_space<vmem>>, %arg6: memref<1x32x16xf32, #tpu.memory_space<vmem>>, %arg7: memref<1x1x16xf32, #tpu.memory_space<vmem>>, %arg8: memref<1x8x32xf32, #tpu.memory_space<vmem>>, %arg9: memref<1x32xf32, #tpu.memory_space<vmem>>, %arg10: memref<1x8x32xf32, #tpu.memory_space<vmem>>, %arg11: memref<8x8xf32, #tpu.memory_space<vmem>>, %arg12: memref<8x1xf32, #tpu.memory_space<vmem>>, %arg13: memref<8x1xf32, #tpu.memory_space<vmem>>, %arg14: memref<8x8xf32, #tpu.memory_space<vmem>>, %arg15: memref<8x32xf32, #tpu.memory_space<vmem>>) attributes {dimension_semantics = [#tpu.dimension_semantics<parallel>, #tpu.dimension_semantics<arbitrary>, #tpu.dimension_semantics<arbitrary>], iteration_bounds = array<i64: 2, 4, 1>, scalar_prefetch = 0 : i64, scratch_operands = 5 : i64, tpu.core_type = #tpu.core_type<tc>, window_params = [{transform_indices = @transform_0, window_bounds = array<i64: 1, 8, 32>}, {transform_indices = @transform_1, window_bounds = array<i64: 1, 32, 8>}, {transform_indices = @transform_2, window_bounds = array<i64: 1, 1, 8>}, {transform_indices = @transform_3, window_bounds = array<i64: 1, 32, 16>}, {transform_indices = @transform_4, window_bounds = array<i64: 1, 1, 16>}, {transform_indices = @transform_5, window_bounds = array<i64: 1, 8, 32>}, {pipeline_mode = #tpu.pipeline_mode<synchronous>, transform_indices = @transform_6, window_bounds = array<i64: 1, 32>}, {transform_indices = @transform_7, window_bounds = array<i64: 1, 8, 32>}]} {
    %c0_i32 = arith.constant 0 : i32
    %0 = arith.cmpi eq, %arg2, %c0_i32 : i32
    %1 = arith.extui %0 : i1 to i32
    %c0_i32_0 = arith.constant 0 : i32
    %2 = arith.cmpi ne, %1, %c0_i32_0 : i32
    scf.if %2 {
      %c0_28 = arith.constant 0 : index
      %c0_29 = arith.constant 0 : index
      %c0_30 = arith.constant 0 : index
      %44 = vector.load %arg3[%c0_28, %c0_29, %c0_30] : memref<1x8x32xf32, #tpu.memory_space<vmem>>, vector<1x8x32xf32>
      %45 = vector.shape_cast %44 : vector<1x8x32xf32> to vector<8x32xf32>
      %c0_31 = arith.constant 0 : index
      %c0_32 = arith.constant 0 : index
      %c0_33 = arith.constant 0 : index
      %46 = vector.load %arg4[%c0_31, %c0_32, %c0_33] : memref<1x32x8xf32, #tpu.memory_space<vmem>>, vector<1x32x8xf32>
      %47 = vector.shape_cast %46 : vector<1x32x8xf32> to vector<32x8xf32>
      %cst_34 = arith.constant dense<0.000000e+00> : vector<8x8xf32>
      %48 = tpu.matmul %45, %47, %cst_34 {dimension_numbers = #tpu.dot_dimension_numbers<[1], [0], [0], [1], [0, 0, 1, 1], [], []>} : vector<8x32xf32>, vector<32x8xf32>, vector<8x8xf32> -> vector<8x8xf32>
      %c0_35 = arith.constant 0 : index
      %c0_36 = arith.constant 0 : index
      %c0_37 = arith.constant 0 : index
      %49 = vector.load %arg5[%c0_35, %c0_36, %c0_37] : memref<1x1x8xf32, #tpu.memory_space<vmem>>, vector<1x1x8xf32>
      %50 = vector.shape_cast %49 : vector<1x1x8xf32> to vector<1x8xf32>
      %51 = vector.broadcast %50 : vector<1x8xf32> to vector<8x8xf32>
      %52 = arith.addf %48, %51 : vector<8x8xf32>
      %cst_38 = arith.constant 0.176776692 : f32
      %53 = vector.broadcast %cst_38 : f32 to vector<8x8xf32>
      %54 = arith.mulf %52, %53 : vector<8x8xf32>
      %c0_39 = arith.constant 0 : index
      %c0_40 = arith.constant 0 : index
      %55 = vector.load %arg11[%c0_39, %c0_40] : memref<8x8xf32, #tpu.memory_space<vmem>>, vector<8x8xf32>
      tpu.vector_store %arg11[%c0_39, %c0_40], %54 {strides = array<i32>} : memref<8x8xf32, #tpu.memory_space<vmem>>, vector<8x8xf32>,
      %cst_41 = arith.constant 0xFF800000 : f32
      %56 = vector.broadcast %cst_41 : f32 to vector<8x1xf32>
      %c0_42 = arith.constant 0 : index
      %c0_43 = arith.constant 0 : index
      %57 = vector.load %arg12[%c0_42, %c0_43] : memref<8x1xf32, #tpu.memory_space<vmem>>, vector<8x1xf32>
      tpu.vector_store %arg12[%c0_42, %c0_43], %56 {strides = array<i32>} : memref<8x1xf32, #tpu.memory_space<vmem>>, vector<8x1xf32>,
      %cst_44 = arith.constant 0.000000e+00 : f32
      %58 = vector.broadcast %cst_44 : f32 to vector<8x1xf32>
      %c0_45 = arith.constant 0 : index
      %c0_46 = arith.constant 0 : index
      %59 = vector.load %arg13[%c0_45, %c0_46] : memref<8x1xf32, #tpu.memory_space<vmem>>, vector<8x1xf32>
      tpu.vector_store %arg13[%c0_45, %c0_46], %58 {strides = array<i32>} : memref<8x1xf32, #tpu.memory_space<vmem>>, vector<8x1xf32>,
      %cst_47 = arith.constant 0.000000e+00 : f32
      %60 = vector.broadcast %cst_47 : f32 to vector<8x8xf32>
      %c0_48 = arith.constant 0 : index
      %c0_49 = arith.constant 0 : index
      %61 = vector.load %arg14[%c0_48, %c0_49] : memref<8x8xf32, #tpu.memory_space<vmem>>, vector<8x8xf32>
      tpu.vector_store %arg14[%c0_48, %c0_49], %60 {strides = array<i32>} : memref<8x8xf32, #tpu.memory_space<vmem>>, vector<8x8xf32>,
      %c0_i32_50 = arith.constant 0 : i32
      %62 = arith.cmpi eq, %arg1, %c0_i32_50 : i32
      %63 = arith.extui %62 : i1 to i32
      %c0_i32_51 = arith.constant 0 : i32
      %64 = arith.cmpi ne, %63, %c0_i32_51 : i32
      scf.if %64 {
        %cst_52 = arith.constant 0.000000e+00 : f32
        %65 = vector.broadcast %cst_52 : f32 to vector<8x32xf32>
        %c0_53 = arith.constant 0 : index
        %c0_54 = arith.constant 0 : index
        %66 = vector.load %arg15[%c0_53, %c0_54] : memref<8x32xf32, #tpu.memory_space<vmem>>, vector<8x32xf32>
        tpu.vector_store %arg15[%c0_53, %c0_54], %65 {strides = array<i32>} : memref<8x32xf32, #tpu.memory_space<vmem>>, vector<8x32xf32>,
      } else {
      }
    } else {
    }
    %c8_i32 = arith.constant 8 : i32
    %3 = arith.muli %arg2, %c8_i32 : i32
    %4 = tpu.assume_multiple %3, 8 : i32
    %c0 = arith.constant 0 : index
    %5 = arith.index_cast %4 : i32 to index
    %c0_1 = arith.constant 0 : index
    %6 = vector.load %arg3[%c0, %5, %c0_1] : memref<1x8x32xf32, #tpu.memory_space<vmem>>, vector<1x8x32xf32>
    %7 = vector.shape_cast %6 : vector<1x8x32xf32> to vector<8x32xf32>
    %c0_2 = arith.constant 0 : index
    %c0_3 = arith.constant 0 : index
    %c0_4 = arith.constant 0 : index
    %8 = vector.load %arg6[%c0_2, %c0_3, %c0_4] : memref<1x32x16xf32, #tpu.memory_space<vmem>>, vector<1x32x16xf32>
    %9 = vector.shape_cast %8 : vector<1x32x16xf32> to vector<32x16xf32>
    %cst = arith.constant dense<0.000000e+00> : vector<8x16xf32>
    %10 = tpu.matmul %7, %9, %cst {dimension_numbers = #tpu.dot_dimension_numbers<[1], [0], [0], [1], [0, 0, 1, 1], [], []>} : vector<8x32xf32>, vector<32x16xf32>, vector<8x16xf32> -> vector<8x16xf32>
    %c0_5 = arith.constant 0 : index
    %c0_6 = arith.constant 0 : index
    %c0_7 = arith.constant 0 : index
    %11 = vector.load %arg7[%c0_5, %c0_6, %c0_7] : memref<1x1x16xf32, #tpu.memory_space<vmem>>, vector<1x1x16xf32>
    %12 = vector.shape_cast %11 : vector<1x1x16xf32> to vector<1x16xf32>
    %13 = vector.broadcast %12 : vector<1x16xf32> to vector<8x16xf32>
    %14 = arith.addf %10, %13 : vector<8x16xf32>
    %15 = vector.extract_strided_slice %14 {offsets = [0, 0], sizes = [8, 8], strides = [1, 1]} : vector<8x16xf32> to vector<8x8xf32>
    %16 = vector.extract_strided_slice %14 {offsets = [0, 8], sizes = [8, 8], strides = [1, 1]} : vector<8x16xf32> to vector<8x8xf32>
    %c0_8 = arith.constant 0 : index
    %c0_9 = arith.constant 0 : index
    %17 = vector.load %arg11[%c0_8, %c0_9] : memref<8x8xf32, #tpu.memory_space<vmem>>, vector<8x8xf32>
    %cst_10 = arith.constant dense<0.000000e+00> : vector<8x8xf32>
    %18 = tpu.matmul %17, %15, %cst_10 {dimension_numbers = #tpu.dot_dimension_numbers<[1], [1], [0], [0], [0, 0, 1, 0], [], []>} : vector<8x8xf32>, vector<8x8xf32>, vector<8x8xf32> -> vector<8x8xf32>
    %c0_11 = arith.constant 0 : index
    %c0_12 = arith.constant 0 : index
    %19 = vector.load %arg12[%c0_11, %c0_12] : memref<8x1xf32, #tpu.memory_space<vmem>>, vector<8x1xf32>
    %cst_13 = arith.constant dense<0xFF800000> : vector<8xf32>
    %20 = vector.multi_reduction <maximumf>, %18, %cst_13 [1] : vector<8x8xf32> to vector<8xf32>
    %21 = vector.shape_cast %20 : vector<8xf32> to vector<8x1xf32>
    %22 = arith.maximumf %19, %21 : vector<8x1xf32>
    %23 = arith.subf %19, %22 : vector<8x1xf32>
    %24 = math.exp %23 : vector<8x1xf32>
    %25 = vector.broadcast %22 : vector<8x1xf32> to vector<8x8xf32>
    %26 = arith.subf %18, %25 : vector<8x8xf32>
    %27 = math.exp %26 : vector<8x8xf32>
    %c0_14 = arith.constant 0 : index
    %c0_15 = arith.constant 0 : index
    %28 = vector.load %arg13[%c0_14, %c0_15] : memref<8x1xf32, #tpu.memory_space<vmem>>, vector<8x1xf32>
    %29 = arith.mulf %24, %28 : vector<8x1xf32>
    %cst_16 = arith.constant dense<0.000000e+00> : vector<8xf32>
    %30 = vector.multi_reduction <add>, %27, %cst_16 [1] : vector<8x8xf32> to vector<8xf32>
    %31 = vector.shape_cast %30 : vector<8xf32> to vector<8x1xf32>
    %32 = arith.addf %29, %31 : vector<8x1xf32>
    %c0_17 = arith.constant 0 : index
    %c0_18 = arith.constant 0 : index
    %33 = vector.load %arg13[%c0_17, %c0_18] : memref<8x1xf32, #tpu.memory_space<vmem>>, vector<8x1xf32>
    tpu.vector_store %arg13[%c0_17, %c0_18], %32 {strides = array<i32>} : memref<8x1xf32, #tpu.memory_space<vmem>>, vector<8x1xf32>,
    %c0_19 = arith.constant 0 : index
    %c0_20 = arith.constant 0 : index
    %34 = vector.load %arg14[%c0_19, %c0_20] : memref<8x8xf32, #tpu.memory_space<vmem>>, vector<8x8xf32>
    %35 = vector.broadcast %24 : vector<8x1xf32> to vector<8x8xf32>
    %36 = arith.mulf %35, %34 : vector<8x8xf32>
    %cst_21 = arith.constant dense<0.000000e+00> : vector<8x8xf32>
    %37 = tpu.matmul %27, %16, %cst_21 {dimension_numbers = #tpu.dot_dimension_numbers<[1], [0], [0], [1], [0, 0, 1, 1], [], []>} : vector<8x8xf32>, vector<8x8xf32>, vector<8x8xf32> -> vector<8x8xf32>
    %38 = arith.addf %36, %37 : vector<8x8xf32>
    %c0_22 = arith.constant 0 : index
    %c0_23 = arith.constant 0 : index
    %39 = vector.load %arg14[%c0_22, %c0_23] : memref<8x8xf32, #tpu.memory_space<vmem>>, vector<8x8xf32>
    tpu.vector_store %arg14[%c0_22, %c0_23], %38 {strides = array<i32>} : memref<8x8xf32, #tpu.memory_space<vmem>>, vector<8x8xf32>,
    %c0_24 = arith.constant 0 : index
    %c0_25 = arith.constant 0 : index
    %40 = vector.load %arg12[%c0_24, %c0_25] : memref<8x1xf32, #tpu.memory_space<vmem>>, vector<8x1xf32>
    tpu.vector_store %arg12[%c0_24, %c0_25], %22 {strides = array<i32>} : memref<8x1xf32, #tpu.memory_space<vmem>>, vector<8x1xf32>,
    %c0_i32_26 = arith.constant 0 : i32
    %41 = arith.cmpi eq, %arg2, %c0_i32_26 : i32
    %42 = arith.extui %41 : i1 to i32
    %c0_i32_27 = arith.constant 0 : i32
    %43 = arith.cmpi ne, %42, %c0_i32_27 : i32
    scf.if %43 {
      %c0_28 = arith.constant 0 : index
      %c0_29 = arith.constant 0 : index
      %44 = vector.load %arg14[%c0_28, %c0_29] : memref<8x8xf32, #tpu.memory_space<vmem>>, vector<8x8xf32>
      %c0_30 = arith.constant 0 : index
      %c0_31 = arith.constant 0 : index
      %45 = vector.load %arg13[%c0_30, %c0_31] : memref<8x1xf32, #tpu.memory_space<vmem>>, vector<8x1xf32>
      %46 = tpu.reciprocal %45 {approx = true} : vector<8x1xf32> -> vector<8x1xf32>
      %47 = vector.broadcast %46 : vector<8x1xf32> to vector<8x8xf32>
      %48 = arith.mulf %44, %47 : vector<8x8xf32>
      %c0_32 = arith.constant 0 : index
      %c0_33 = arith.constant 0 : index
      %49 = vector.load %arg15[%c0_32, %c0_33] : memref<8x32xf32, #tpu.memory_space<vmem>>, vector<8x32xf32>
      %c0_34 = arith.constant 0 : index
      %c0_35 = arith.constant 0 : index
      %c0_36 = arith.constant 0 : index
      %50 = vector.load %arg8[%c0_34, %c0_35, %c0_36] : memref<1x8x32xf32, #tpu.memory_space<vmem>>, vector<1x8x32xf32>
      %51 = vector.shape_cast %50 : vector<1x8x32xf32> to vector<8x32xf32>
      %cst_37 = arith.constant dense<0.000000e+00> : vector<8x32xf32>
      %52 = tpu.matmul %48, %51, %cst_37 {dimension_numbers = #tpu.dot_dimension_numbers<[1], [0], [0], [1], [0, 0, 1, 1], [], []>} : vector<8x8xf32>, vector<8x32xf32>, vector<8x32xf32> -> vector<8x32xf32>
      %53 = arith.addf %49, %52 : vector<8x32xf32>
      %c0_38 = arith.constant 0 : index
      %c0_39 = arith.constant 0 : index
      %54 = vector.load %arg15[%c0_38, %c0_39] : memref<8x32xf32, #tpu.memory_space<vmem>>, vector<8x32xf32>
      tpu.vector_store %arg15[%c0_38, %c0_39], %53 {strides = array<i32>} : memref<8x32xf32, #tpu.memory_space<vmem>>, vector<8x32xf32>,
      %c3_i32 = arith.constant 3 : i32
      %55 = arith.cmpi eq, %arg1, %c3_i32 : i32
      %56 = arith.extui %55 : i1 to i32
      %c0_i32_40 = arith.constant 0 : i32
      %57 = arith.cmpi ne, %56, %c0_i32_40 : i32
      scf.if %57 {
        %c0_41 = arith.constant 0 : index
        %c0_42 = arith.constant 0 : index
        %58 = vector.load %arg15[%c0_41, %c0_42] : memref<8x32xf32, #tpu.memory_space<vmem>>, vector<8x32xf32>
        %c0_43 = arith.constant 0 : index
        %c0_44 = arith.constant 0 : index
        %59 = vector.load %arg9[%c0_43, %c0_44] : memref<1x32xf32, #tpu.memory_space<vmem>>, vector<1x32xf32>
        %60 = vector.broadcast %59 : vector<1x32xf32> to vector<8x32xf32>
        %61 = arith.addf %58, %60 : vector<8x32xf32>
        %c0_45 = arith.constant 0 : index
        %c0_46 = arith.constant 0 : index
        %c0_47 = arith.constant 0 : index
        %62 = vector.load %arg10[%c0_45, %c0_46, %c0_47] : memref<1x8x32xf32, #tpu.memory_space<vmem>>, vector<1x8x32xf32>
        %63 = vector.shape_cast %62 : vector<1x8x32xf32> to vector<8x32xf32>
        %64 = vector.shape_cast %61 : vector<8x32xf32> to vector<1x8x32xf32>
        tpu.vector_store %arg10[%c0_45, %c0_46, %c0_47], %64 {strides = array<i32>} : memref<1x8x32xf32, #tpu.memory_space<vmem>>, vector<1x8x32xf32>,
      } else {
      }
    } else {
    }
    return
  }
  func.func @transform_0(%arg0: i32, %arg1: i32, %arg2: i32) -> (i32, i32, i32) {
    %c0_i32 = arith.constant 0 : i32
    %c0_i32_0 = arith.constant 0 : i32
    %c0_i32_1 = arith.constant 0 : i32
    return %arg0, %c0_i32, %c0_i32_0 : i32, i32, i32
  }
  func.func @transform_1(%arg0: i32, %arg1: i32, %arg2: i32) -> (i32, i32, i32) {
    %c0_i32 = arith.constant 0 : i32
    %c0_i32_0 = arith.constant 0 : i32
    %c0_i32_1 = arith.constant 0 : i32
    return %arg1, %c0_i32, %c0_i32_0 : i32, i32, i32
  }
  func.func @transform_2(%arg0: i32, %arg1: i32, %arg2: i32) -> (i32, i32, i32) {
    %c0_i32 = arith.constant 0 : i32
    %c0_i32_0 = arith.constant 0 : i32
    %c0_i32_1 = arith.constant 0 : i32
    return %arg1, %c0_i32, %c0_i32_0 : i32, i32, i32
  }
  func.func @transform_3(%arg0: i32, %arg1: i32, %arg2: i32) -> (i32, i32, i32) {
    %c0_i32 = arith.constant 0 : i32
    %c0_i32_0 = arith.constant 0 : i32
    %c0_i32_1 = arith.constant 0 : i32
    return %arg1, %c0_i32, %c0_i32_0 : i32, i32, i32
  }
  func.func @transform_4(%arg0: i32, %arg1: i32, %arg2: i32) -> (i32, i32, i32) {
    %c0_i32 = arith.constant 0 : i32
    %c0_i32_0 = arith.constant 0 : i32
    %c0_i32_1 = arith.constant 0 : i32
    return %arg1, %c0_i32, %c0_i32_0 : i32, i32, i32
  }
  func.func @transform_5(%arg0: i32, %arg1: i32, %arg2: i32) -> (i32, i32, i32) {
    %c0_i32 = arith.constant 0 : i32
    %c0_i32_0 = arith.constant 0 : i32
    %c0_i32_1 = arith.constant 0 : i32
    return %arg1, %c0_i32, %c0_i32_0 : i32, i32, i32
  }
  func.func @transform_6(%arg0: i32, %arg1: i32, %arg2: i32) -> (i32, i32) {
    %c0_i32 = arith.constant 0 : i32
    %c0_i32_0 = arith.constant 0 : i32
    %c0_i32_1 = arith.constant 0 : i32
    return %c0_i32, %c0_i32_0 : i32, i32
  }
  func.func @transform_7(%arg0: i32, %arg1: i32, %arg2: i32) -> (i32, i32, i32) {
    %c0_i32 = arith.constant 0 : i32
    %c0_i32_0 = arith.constant 0 : i32
    %c0_i32_1 = arith.constant 0 : i32
    return %arg0, %c0_i32, %c0_i32_0 : i32, i32, i32
  }
}

</mosaic_0001>

<bundles_post_ra>
// kernel: tpu_custom_call.1
= control target key start
LH: loop header
LB: loop body
LE: loop exit
PB: predicated region body
PF: predicated region fallthrough
CT: control target
= control target key end

     0   :  { %12 = vsyncpa [#allocation8], 0  ;;  %s1544_s0 = inlined_call_operand.vmem [shape: f32[2,8,32], index: 0, kind: input, shape index: {}]   ;;  %s1545_s1 = inlined_call_operand.vmem [shape: f32[4,32,8], index: 1, kind: input, shape index: {}]   ;;  %s1546_s2 = inlined_call_operand.vmem [shape: f32[4,1,8], index: 2, kind: input, shape index: {}]   ;;  %s1547_s3 = inlined_call_operand.vmem [shape: f32[4,32,16], index: 3, kind: input, shape index: {}]   ;;  %s1548_s4 = inlined_call_operand.vmem [shape: f32[4,1,16], index: 4, kind: input, shape index: {}]   ;;  %s1549_s5 = inlined_call_operand.vmem [shape: f32[4,8,32], index: 5, kind: input, shape index: {}]   ;;  %s1550_s6 = inlined_call_operand.vmem [shape: f32[1,32], index: 6, kind: input, shape index: {}]   ;;  %s1551_s7 = inlined_call_operand.hbm [shape: f32[2,8,32], index: 7, kind: output, shape index: {}]  }
   0x1   :  { %14 = vsyncpa [#allocation8 + $0x1], 0  ;;  %s1326_s24 = smov 0   ;;  %s1328_s25 = smov 0  }
   0x2   :  { %s1330_s26 = smov 0   ;;  %s1332_s27 = smov 0  }
   0x3   :  { %s1334_s28 = smov 0   ;;  %s1336_s29 = smov 0  }
   0x4   :  { %s1338_s30 = smov 0   ;;  %s1340_s8 = smov 0  }
   0x5 LB: > { %1558 = sst [smem:[#allocation10_spill]] %s1256_s26  ;;  %s1002_s9 = sadd.s32 4294967295, %s1276_s8   ;;  %s1276_s8 = sphi %s1340_s8, %s20_s8   ;;  %s1272_s30 = sphi %s1338_s30, %s1574_s30   ;;  %s1268_s29 = sphi %s1336_s29, %s1573_s29   ;;  %s1264_s28 = sphi %s1334_s28, %s1572_s28   ;;  %s1260_s27 = sphi %s1332_s27, %s1571_s27   ;;  %s1256_s26 = sphi %s1330_s26, %s1570_s26   ;;  %s1252_s25 = sphi %s1328_s25, %s1576_s25   ;;  %s1248_s24 = sphi %s1326_s24, %s1575_s24  }
   0x6   : > { %1559 = sst [smem:[#allocation11_spill]] %s1268_s29  ;;  %s1003_s10 = sadd.s32 4294967294, %s1276_s8  }
   0x7   : > { %1560 = sst [smem:[#allocation12_spill]] %s1272_s30  ;;  %s35_s11 = sadd.s32 1, %s1268_s29 }
   0x8   : > { %p37_p0 = scmp.ge.s32.totalorder %s35_s11, 4  ;;  %s39_s12 = sadd.s32 1, %s1272_s30 }
   0x9   : > { %p233_p1 = scmp.ne.s32.totalorder %s1256_s26, %s1252_s25  ;;  %p234_p2 = scmp.eq.s32.totalorder %s1002_s9, 7 }
   0xa   : > { %s1578_s11 = smov (%p37_p0, %s35_s11), 0  ;;  %s1580_s12 = smov (!%p37_p0, %s39_s12), %s1272_s30 }
   0xb   : > { %1561 = sst [smem:[#allocation13_spill]] %s1578_s11  ;;  %p1375_p3 = por %p234_p2, %p233_p1 }
   0xc   : > { %p239_p4 = scmp.ne.s32.totalorder %s1252_s25, %s1248_s24  ;;  %p41_p5 = scmp.ge.s32.totalorder %s1580_s12, 2 }
   0xd   : > { %p240_p6 = scmp.eq.s32.totalorder %s1003_s10, 7  ;;  %p1006_p7 = scmp.ge.s32.totalorder %s1276_s8, 1 }
   0xe   : > { %p303_p8 = scmp.lt.s32.totalorder %s1276_s8, 9  ;;  %s1582_s12 = smov (%p41_p5, %s1580_s12), 0 }
   0xf   : > { %1563 = sst [smem:[#allocation14_spill]] %s1582_s12  ;;  %p1385_p9 = por %p240_p6, %p239_p4 }
  0x10   : > { %p304_p10 = pnand %p1006_p7, %p303_p8  ;;  %s220_s15 = ssub.s32 %s1272_s30, %s1582_s12 }
  0x11   : > { %s1564_s14 = scalar_select %p1385_p9, 1, 0 }
  0x12   : > { %s223_s16 = sadd.s32 1, %s1256_s26  ;;  %p221_p11 = scmp.eq.s32.totalorder %s220_s15, 0  ;;  %vm469_vm0 = vcmask (!%p304_p10), 64512   ;;  %v1278_v0 = vmov (!%p304_p10), 0.0|0.0   ;;  %vm1279_vm1 = vmmov (!%p304_p10), 0   ;;  %v1280_v1 = vmov (!%p304_p10), 0.0  }
  0x13   : > { %1565 = sst [smem:[#allocation15_spill]] %s1564_s14  ;;  %307 = sbr.rel (%p304_p10) target bundleno = 1528 (0x5f8), region = 48  ;;  %1084 = vmatprep.subr.bf16.mxu0 (!%p304_p10), %v1278_v0  ;;  %1055 = vmatprep.mubr.msk.f32.mxu0 (!%p304_p10), %vm1279_vm1, %v1280_v1  ;;  %vm471_vm2 = vcmask (!%p304_p10), 7168   ;;  %474 = vst.msk [vmem:[#allocation5] sm:$0xff] (!%p304_p10), %vm469_vm0, %v1280_v1  ;;  %v1281_v2 = vmov (!%p304_p10), -inf   ;;  %vm394_vm3 = vcmask (!%p304_p10), 261120  }
  0x14   : > { %s1393_s17 = scalar_select %p221_p11, %s1256_s26, %s223_s16  }
  0x15   : > { %s1552_s18 = sand.u32 (!%p304_p10), 1, %s1252_s25   ;;  %p358_p12 = scmp.lt.s32.totalorder (!%p304_p10), %s1260_s27, 3  ;;  %472 = vst.msk [vmem:[#allocation3] sm:$0xff] (!%p304_p10), %vm471_vm2, %v1281_v2  ;;  %473 = vst.msk [vmem:[#allocation4] sm:$0xff] (!%p304_p10), %vm471_vm2, %v1280_v1 }
  0x16   : > { %1566 = sst [smem:[#allocation16_spill]] %s1393_s17  ;;  %s1399_s19 = sshll.u32 (!%p304_p10), %s1552_s18, 3 }
  0x17   : > { %p354_p13 = scmp.lt.s32.totalorder (!%p304_p10), %s1264_s28, 1  ;;  %p1016_p0 = scmp.ne.s32.totalorder (!%p304_p10), %s1260_s27, 0 }
  0x1a   : > { %s1412_s20 = scalar_select %p358_p12, %s1260_s27, 3 }
  0x1b   : > { %s355_s21 = scalar_select %p354_p13, %s1264_s28, 1 }
  0x1c   : > { %s1029_s22 = sshll.u32 %s1412_s20, 5  ;;  %s373_s10 = scalar_lea.vmem %s1548_s4, %s1412_s20  ;;  %v1282_v15 = vmov (!%p1016_p0), 0.0  }
  0x1d   : > { %s362_s18 = scalar_lea.vmem %s1545_s1, %s1029_s22  ;;  %s1426_s30 = scalar_lea.vmem %s1547_s3, %s1029_s22  ;;  %479 = vst.msk [vmem:[#allocation6] sm:$0xff] (!%p1016_p0), %vm394_vm3, %v1282_v15 }
  0x1e   : > { %s1013_s29 = sshll.u32 %s1412_s20, 3  ;;  %v383_v3 = vld [vmem:[%s362_s18] sm:$0xff]  ;;  %v384_v4 = vld [vmem:[%s362_s18 + $0x8] sm:$0xff]  ;;  %v385_v5 = vld [vmem:[%s362_s18 + $0x10] sm:$0xff]  ;;  %s1008_s23 = sshll.u32 %s355_s21, 3 }
  0x1f   : > { %s1432_s14 = scalar_lea.vmem %s1549_s5, %s1013_s29  ;;  %v1085_v6 = vpack.c.bf16 %v384_v4, %v383_v3  ;;  %v386_v7 = vld [vmem:[%s362_s18 + $0x18] sm:$0xff]  ;;  %s1437_s22 = scalar_lea.vmem %s1544_s0, %s1008_s23 }
  0x20   : > { %v1088_v8 = vpack.c.bf16 %v386_v7, %v385_v5  ;;  %v382_v9 = vld [vmem:[%s1437_s22] sm:$0xff]  ;;  %s365_s17 = scalar_lea.vmem %s1546_s2, %s1412_s20  ;;  %s353_s18 = scalar_lea.vmem [#allocation7], %s1399_s19 }
  0x21   : > { %1086 = vmatpush3.bf16.msra.mxu0 %v1085_v6  ;;  %v1014_v10 = vld [vmem:[%s365_s17] ss:$0 sm:$0xff] }
  0x22   : > { %1087 = vmatprep.subr.bf16.mxu0 %v1278_v0 }
  0x25   : > { %1089 = vmatpush3.bf16.msra.mxu0 %v1088_v8 }
  0x28   : > { %1056 = vmatmul.mubr.msk.f32.vlgmr.msra.gmra.mrb[0].mxu0 %vm394_vm3, %v382_v9 }
  0xfa   : > { %478 = sbr.rel (%p1016_p0) target bundleno = 257 (0x101), region = 56 }
  0xfb   : > { %v464_v11 = vpop.f32.mrb[0].mxu0 }
  0xfc   : > { %v465_v12 = vadd.f32 %v1014_v10, %v464_v11  ;;  %v1057_v13 = vpop.f32.mrb[1].mxu0 }
  0xfe   : > { %v468_v14 = vmul.f32 0.17677669, %v465_v12 }
 0x100   : > { %470 = vst.msk [vmem:[#allocation2] sm:$0xff] %vm469_vm0, %v468_v14 }
 0x101 PF: > { %1090 = vmatprep.subr.bf16.mxu1 %v1278_v0  ;;  %v483_v16 = vld [vmem:[%s1426_s30] sm:$0xff]  ;;  %v484_v17 = vld [vmem:[%s1426_s30 + $0x8] sm:$0xff]  ;;  %v485_v18 = vld [vmem:[%s1426_s30 + $0x10] sm:$0xff]  ;;  %1066 = vmatprep.mubr.msk.f32.mxu1 %vm1279_vm1, %v1280_v1  ;;  %v1284_v32 = vmov 0   ;;  %p1023_p1 = scmp.ne.s32.totalorder %s1260_s27, 3 }
 0x102   : > { %v1091_v19 = vpack.c.bf16 %v484_v17, %v483_v16  ;;  %v486_v20 = vld [vmem:[%s1426_s30 + $0x18] sm:$0xff]  ;;  %1069 = vmatprep.subr.mxu0 %v1280_v1  ;;  %1071 = vmatprep.mubr.msk.f32.mxu0 %vm1279_vm1, %v1280_v1  ;;  %v482_v22 = vld [vmem:[%s1437_s22] sm:$0xff]  ;;  %s1283_s30 = smov 120   ;;  %v646_v33 = vld [vmem:[#allocation3] sm:$0xff] }
 0x103   : > { %v1094_v21 = vpack.c.bf16 %v486_v20, %v485_v18  ;;  %v1017_v23 = vld [vmem:[%s373_s10] ss:$0 sm:$0xff]  ;;  %1174 = vset.pattern.permute.xlu0 %v1284_v32  ;;  %1175 = vset.pattern.permute.xlu1 %v1284_v32  ;;  %v662_v45 = vld [vmem:[#allocation4] sm:$0xff]  ;;  %v670_v51 = vld [vmem:[#allocation5] sm:$0xff] }
 0x104   : > { %1092 = vmatpush3.bf16.msra.mxu1 %v1091_v19  ;;  %v769_v44 = vld [vmem:[%s1432_s14] sm:$0xff] }
 0x105   : > { %1093 = vmatprep.subr.bf16.mxu1 %v1278_v0  ;;  %v768_v60 = vld [vmem:[#allocation6] sm:$0xff] }
 0x107   : > { %v568_v27 = vld [vmem:[#allocation2] sm:$0xff] }
 0x108   : > { %1095 = vmatpush3.bf16.msra.mxu1 %v1094_v21 }
 0x109   : > { %1074 = vmatprep.subr.mxu1 %v1280_v1 }
 0x10b   : > { %1067 = vmatmul.mubr.msk.f32.vlgmr.msra.gmra.mrb[0].mxu1 %vm394_vm3, %v482_v22 }
 0x10c   : > { %1076 = vmatprep.mubr.msk.f32.mxu1 %vm1279_vm1, %v1280_v1 }
 0x1de   : > { %v564_v24 = vpop.f32.mrb[0].mxu1 }
 0x1df   : > { %v565_v25 = vadd.f32 %v1017_v23, %v564_v24  ;;  %v1068_v26 = vpop.f32.mrb[1].mxu1 }
 0x1e1   : > { %677 = vrot.lane.b32.xlu1 %v565_v25, %s1283_s30  ;;  %1070 = vmatpush3.xpose.msk.msra.mxu0 %vm469_vm0, %v565_v25 }
 0x1e2   : > { %1079 = vmatprep.subr.mxu0 %v1280_v1 }
 0x1e4   : > { %1072 = vmatmul.mubr.msk.f32.vlgmr.msra.gmra.mrb[2].mxu0 %vm469_vm0, %v568_v27 }
 0x1e5   : > { %1081 = vmatprep.mubr.msk.f32.mxu0 %vm1279_vm1, %v1280_v1  ;;  %1080 = vmatpush3.msra.mxu0 %v769_v44  ;;  %v1024_v1 = vld [vmem:[%s1550_s6] ss:$0 sm:$0xff] (!%p1023_p1) }
 0x253   : > { %v678_v28 = vpop.permute.xlu1 %677 }
 0x254   : > { %1075 = vmatpush3.msra.mxu1 %v678_v28 }
 0x2b7   : > { %v642_v29 = vpop.f32.mrb[2].mxu0 }
 0x2b8   : > { %v1073_v30 = vpop.f32.mrb[3].mxu0  ;;  %v647_v31 = vsel %vm469_vm0, %v642_v29, -inf }
 0x2b9   : > { %648 = vmax.xlane.f32.xlu0 %v647_v31 }
 0x346   : > { %v649_v34 = vpop.xlane.xlu0 %648 }
 0x347   : > { %v650_v35 = vmax.f32 %v646_v33, %v649_v34 }
 0x349   : > { %v651_v36 = vsub.f32 %v646_v33, %v650_v35  ;;  %755 = vst.msk [vmem:[#allocation3] sm:$0xff] %vm471_vm2, %v650_v35  ;;  %656 = vperm.xlu0 %1174, %v650_v35  }
 0x34b   : > { %v652_v42 = vmul.f32 1.442695, %v651_v36 }
 0x3c8   : > { %v657_v37 = vpop.permute.xlu0 %656 }
 0x3c9   : > { %v659_v38 = vsub.f32 %v642_v29, %v657_v37 }
 0x3cb   : > { %v660_v39 = vmul.f32 1.442695, %v659_v38 }
 0x3cd   : > { %1176 = vpow2.f32 %v660_v39 }
 0x3ce   : > { %1178 = vpow2.f32 %v652_v42 }
 0x3d7   : > { %v1177_v40 = vpop.eup %1176 }
 0x3d8   : > { %1077 = vmatmul.mubr.msk.f32.vlgmr.msra.gmra.mrb[2].mxu1 %vm469_vm0, %v1177_v40  ;;  %v664_v41 = vsel %vm469_vm0, %v1177_v40, 0.0  ;;  %v1179_v43 = vpop.eup %1178 }
 0x3d9   : > { %665 = vadd.xlane.f32.xlu1 %v664_v41  ;;  %v663_v46 = vmul.f32 %v1179_v43, %v662_v45 }
 0x3ea   : > { %673 = vperm.xlu1 %1175, %v1179_v43  }
 0x466   : > { %v666_v47 = vpop.xlane.xlu1 %665 }
 0x467   : > { %v667_v48 = vadd.f32 %v666_v47, %v663_v46 }
 0x469   : > { %669 = vst.msk [vmem:[#allocation4] sm:$0xff] %vm471_vm2, %v667_v48 }
 0x46a   : > { %v674_v52 = vpop.permute.xlu1 %673 }
 0x46b   : > { %v676_v53 = vmul.f32 %v674_v52, %v670_v51 }
 0x470   : > { %v760_v49 = vld [vmem:[#allocation4] sm:$0xff] }
 0x471   : > { %1180 = vrcp.f32 %v760_v49 }
 0x47b   : > { %v1181_v50 = vpop.eup %1180 }
 0x47c   : > { %764 = vperm.xlu0 %1174, %v1181_v50  }
 0x4ab   : > { %v749_v54 = vpop.f32.mrb[2].mxu1 }
 0x4ac   : > { %v753_v55 = vadd.f32 %v749_v54, %v676_v53  ;;  %v1078_v56 = vpop.f32.mrb[3].mxu1 }
 0x4ae   : > { %754 = vst.msk [vmem:[#allocation5] sm:$0xff] %vm469_vm0, %v753_v55 }
 0x4b5   : > { %v759_v58 = vld [vmem:[#allocation5] sm:$0xff] }
 0x4fb   : > { %v765_v57 = vpop.permute.xlu0 %764 }
 0x4fc   : > { %v767_v59 = vmul.f32 %v765_v57, %v759_v58 }
 0x4fe   : > { %1082 = vmatmul.mubr.msk.f32.vlgmr.msra.gmra.mrb[4].mxu0 %vm469_vm0, %v767_v59 }
 0x5ce   : > { %848 = sbr.rel (%p1023_p1) target bundleno = 1503 (0x5df), region = 64 }
 0x5d1   : > { %v839_v61 = vpop.f32.mrb[4].mxu0 }
 0x5d2   : > { %v843_v62 = vadd.f32 %v839_v61, %v768_v60  ;;  %v1083_v63 = vpop.f32.mrb[5].mxu0 }
 0x5d4   : > { %844 = vst.msk [vmem:[#allocation6] sm:$0xff] %vm394_vm3, %v843_v62 }
 0x5db   : > { %v849_v0 = vld [vmem:[#allocation6] sm:$0xff] }
 0x5dc   : > { %v857_v2 = vadd.f32 %v1024_v1, %v849_v0 }
 0x5de   : > { %858 = vst.msk [vmem:[%s353_s18] sm:$0xff] %vm394_vm3, %v857_v2 }
 0x5df PF: > { %s1026_s10 = sshll.u32 %s1264_s28, 7  ;;  %s873_s23 = sshll.u32 %s353_s18, 4  ;;  %s874_s23 = int_to_ptr.vmem [resolvable:$true] %s873_s23 }
 0x5e0   : > { %s1493_s27 = scalar_lea.hbm %s1551_s7, %s1026_s10  ;;  %s1567_s11 = sand.u32 1, %s1252_s25  }
 0x5e1   : > { %s860_s12 = scalar_lea.sflag [#allocation8], %s1567_s11  ;;  %s1182_s22 = scalar_lea.vmem %s874_s23, 128 }
 0x5e2   : > { %p1183_p2 = scmp.ne.s32.totalorder %s874_s23, %s1182_s22  ;;  %s1285_s26 = smov [#allocation7]  }
 0x5e3   : > { %s1186_s29 = sshll.u32 %s1285_s26, 4  ;;  %s1187_s29 = int_to_ptr.vmem [resolvable:$false] %s1186_s29 }
 0x5e4   : > { %p1184_p4 = pnand %p1183_p2, %p1375_p3  ;;  %s1188_s17 = scalar_lea.vmem %s1187_s29, 256 }
 0x5e5   : > { %p1189_p6 = scmp.lt.s32.totalorder %s874_s23, %s1187_s29  ;;  %p1190_p7 = scmp.lt.s32.totalorder %s1188_s17, %s1182_s22 }
 0x5e6   : > { %p1185_p5 = pneg %p1184_p4 }
 0x5e7   : > { %p1191_p8 = por %p1190_p7, %p1189_p6 }
 0x5e9   : > { %p1192_p10 = pnand %p1191_p8, %p1185_p5 }
 0x5eb   : > { %1195 = shalt.err (!%p1192_p10)
}
 0x5ec   : > { %s1196_s28 = scalar_lea.hbm %s1493_s27, 128  ;;  %s1200_s21 = scalar_lea.hbm %s1551_s7, 256 }
 0x5ed   : > { %p1197_p11 = scmp.ne.s32.totalorder %s1493_s27, %s1196_s28  ;;  %p1201_p0 = scmp.lt.u32.totalorder %s1493_s27, %s1551_s7 }
 0x5ee   : > { %p1202_p1 = scmp.lt.u32.totalorder %s1200_s21, %s1196_s28  ;;  %p1204_p4 = scmp.lt.u32.totalorder %s1196_s28, %s1493_s27 }
 0x5ef   : > { %p1198_p12 = pnand %p1197_p11, %p1375_p3 }
 0x5f0   : > { %p1203_p2 = por %p1202_p1, %p1201_p0 }
 0x5f1   : > { %p1199_p13 = pneg %p1198_p12 }
 0x5f2   : > { %p1205_p5 = por %p1204_p4, %p1203_p2 }
 0x5f4   : > { %p1206_p6 = pnand %p1205_p5, %p1199_p13 }
 0x5f6   : > { %1209 = shalt.err (!%p1206_p6)
}
 0x5f7   : > { %1096 = dma.vmem_to_hbm [thread:$0]  (%p1375_p3), %s874_s23, 128, %s1493_s27, %s860_s12  }
 0x5f8 PF: > { %p1102_p7 = scmp.ge.s32.totalorder %s1276_s8, 2  ;;  %s885_s20 = sand.u32 1, %s1248_s24  }
 0x5f9   : > { %s886_s10 = scalar_lea.sflag [#allocation8], %s885_s20 }
 0x5fa   : > { %p1099_p8 = pnand %p1102_p7, %p1385_p9 }
 0x5fc   : > { %1243 = dma.done.wait (!%p1099_p8), %s886_s10, 128  }
 0x5fd   : > { %1245 = vsyncadd (!%p1099_p8), %s886_s10, 4294967168  ;;  %s20_s8 = sadd.s32 1, %s1276_s8   ;;  %s1569_s15 = sld [smem:[#allocation10_spill]] }
 0x5fe   : > { %p17_p10 = scmp.ge.s32.totalorder %s20_s8, 10   ;;  %s1570_s26 = sld [smem:[#allocation16_spill]] }
 0x5ff   : > { %s1571_s27 = sld [smem:[#allocation11_spill]]  ;;  %s1572_s28 = sld [smem:[#allocation12_spill]] }
 0x600   : > { %s1573_s29 = sld [smem:[#allocation13_spill]]  ;;  %s1574_s30 = sld [smem:[#allocation14_spill]] }
 0x601   : > { %s1575_s24 = smov %s1252_s25  ;;  %19 = sbr.rel (!%p17_p10) target bundleno = 5 (0x5), region = 115 }
 0x603   : > { %s1576_s25 = smov %s1569_s15 }
 0x608   :  { %891 = vsyncpa [#allocation8], 1 }
 0x609   :  { %893 = vsyncpa [#allocation8 + $0x1], 1 }

</bundles_post_ra>
